<compile_context>
chip_gen: v7x
topology: tpu7x:2x2x1
jax: 0.10.0
libtpu: 0.0.40
codegen_flags: <defaults>
</compile_context>

<pallas_src>
import jax
import jax.numpy as jnp
from jax.experimental import pallas as pl
from jax.experimental.pallas import tpu as pltpu


def _round_up(x, m):
    return (x + m - 1) // m * m


def _reverse_func_kernel(mul_ref, y_ref, negt_ref, w_ref, b_ref, u_ref, o_ref):
    """One fused-M tile: o = mul * tanh(y @ W + (-t_row) * u + b)."""
    mul = mul_ref[0]                                         # scalar from SMEM

    # Per-row bias via a single outer product against the resident [1, Hp]
    # vectors (the _ReverseFunc time negation is baked into negt_ref rows).
    bias = negt_ref[...] * u_ref[...] + b_ref[...]           # [TM, Hp], f32 (VPU)

    # MXU matmul with f32 accumulation; tanh runs on the EUP, scale on the VPU.
    z = jnp.dot(y_ref[...], w_ref[...],
                preferred_element_type=jnp.float32)          # [TM, Hp]
    o_ref[...] = (mul * jnp.tanh(z + bias)).astype(o_ref.dtype)


def reverse_func_batched(ts, ys, W, b, u, mul=1.0, mxu_dtype=None):
    """Fused: out[i] = mul * base_func(-ts[i], ys[i]) for all i, one pallas_call.

    ys: [S, B, H], ts: [S], W: [H, H], b/u: [1, H] (or [H]).
    mxu_dtype: dtype fed to the MXU (e.g. jnp.bfloat16 on v6e/v7x); tail is f32.
    """
    S, B, H = ys.shape
    f32 = jnp.float32
    out_dtype = ys.dtype
    mxu_dtype = ys.dtype if mxu_dtype is None else mxu_dtype

    # Fold the step axis into the matmul M dimension.
    M = S * B
    y_flat = ys.reshape(M, H)
    # Per-row negated time ("-t" of _ReverseFunc), tiny [M, 1] f32 column.
    negt_rows = jnp.broadcast_to((-jnp.asarray(ts, f32))[:, None], (S, B)).reshape(M, 1)

    sub = 16 if mxu_dtype == jnp.bfloat16 else 8             # sublane packing
    Hp = _round_up(max(H, 128), 128)                         # lane-dense last dim

    # Tile along fused M: prefer large (<=256) tiles, but keep >=2 grid steps
    # when M allows so v7x can shard the "parallel" axis across its two TCs.
    Mp0 = _round_up(max(M, sub), sub)
    if Mp0 >= 512:
        tm = 256
    elif Mp0 >= 2 * sub:
        tm = _round_up(pl.cdiv(Mp0, 2), sub)
    else:
        tm = Mp0
    Mp = _round_up(Mp0, tm)
    grid_m = Mp // tm

    aligned = (Mp == M) and (Hp == H)
    if aligned:
        # Fast path: no pad / no extra HBM copies (reshape + cast only).
        y_p = y_flat.astype(mxu_dtype)
        W_p = W.astype(mxu_dtype)
        b_p = b.reshape(1, H).astype(f32)
        u_p = u.reshape(1, H).astype(f32)
        negt_p = negt_rows
    else:
        # Ragged fallback: zero-pad (matmul-safe); padded rows sliced off below.
        y_p = jnp.zeros((Mp, Hp), mxu_dtype).at[:M, :H].set(y_flat.astype(mxu_dtype))
        W_p = jnp.zeros((Hp, Hp), mxu_dtype).at[:H, :H].set(W.astype(mxu_dtype))
        b_p = jnp.zeros((1, Hp), f32).at[:, :H].set(b.reshape(1, H).astype(f32))
        u_p = jnp.zeros((1, Hp), f32).at[:, :H].set(u.reshape(1, H).astype(f32))
        negt_p = jnp.zeros((Mp, 1), f32).at[:M, :].set(negt_rows)

    mul_arr = jnp.asarray([mul], f32)                        # one SMEM scalar

    out = pl.pallas_call(
        _reverse_func_kernel,
        out_shape=jax.ShapeDtypeStruct((Mp, Hp), out_dtype),
        grid_spec=pltpu.PrefetchScalarGridSpec(
            num_scalar_prefetch=0,
            grid=(grid_m,),
            in_specs=[
                pl.BlockSpec(memory_space=pltpu.SMEM),            # mul
                pl.BlockSpec((tm, Hp), lambda m: (m, 0)),         # fused y tile
                pl.BlockSpec((tm, 1), lambda m: (m, 0)),          # per-row -t
                pl.BlockSpec((Hp, Hp), lambda m: (0, 0)),         # W: VMEM-resident
                pl.BlockSpec((1, Hp), lambda m: (0, 0)),          # b: VMEM-resident
                pl.BlockSpec((1, Hp), lambda m: (0, 0)),          # u: VMEM-resident
            ],
            out_specs=pl.BlockSpec((tm, Hp), lambda m: (m, 0)),
        ),
        compiler_params=pltpu.CompilerParams(
            # Independent row tiles -> both TensorCores on v7x.
            dimension_semantics=("parallel",),
        ),
    )(mul_arr, y_p, negt_p, W_p, b_p, u_p)

    if aligned:
        return out.reshape(S, B, H)
    return out[:M, :H].reshape(S, B, H)


def reverse_func(t, y, W, b, u, mul=1.0, mxu_dtype=None):
    """Module-equivalent forward(t, y) = mul * base_func(-t, y), single eval."""
    ts = jnp.asarray(t, jnp.float32).reshape(1)
    return reverse_func_batched(ts, y[None], W, b, u, mul, mxu_dtype)[0]


def reverse_func_ref(ts, ys, W, b, u, mul=1.0):
    """Pure-JAX reference: mul * tanh(ys @ W + (-t) * u + b), per step."""
    neg_t = -jnp.asarray(ts, jnp.float32).reshape(-1, 1, 1)
    z = jnp.dot(ys.astype(jnp.float32), W.astype(jnp.float32),
                preferred_element_type=jnp.float32)
    return mul * jnp.tanh(z + b.reshape(1, 1, -1) + neg_t * u.reshape(1, 1, -1))


if __name__ == "__main__":
    key = jax.random.PRNGKey(0)
    k_y, k_w, k_b, k_u, k_t = jax.random.split(key, 5)

    # 16 fused solver-step evaluations; fused M = S*B = 128 (aligned fast path).
    S, B, H = 16, 8, 128
    mul = 2.0

    ts = jax.random.uniform(k_t, (S,), dtype=jnp.float32)
    ys = jax.random.normal(k_y, (S, B, H), dtype=jnp.float32)
    W = jax.random.normal(k_w, (H, H), dtype=jnp.float32) * 0.1
    b = jax.random.normal(k_b, (1, H), dtype=jnp.float32) * 0.1
    u = jax.random.normal(k_u, (1, H), dtype=jnp.float32) * 0.1

    ref = reverse_func_ref(ts, ys, W, b, u, mul)

    # f32 MXU path (exact check).
    out_f32 = jax.block_until_ready(reverse_func_batched(ts, ys, W, b, u, mul))
    assert out_f32.shape == (S, B, H)
    assert jnp.allclose(out_f32, ref, atol=1e-5, rtol=1e-5), "f32 batched mismatch"

    # bf16-MXU path (v6e/v7x fast path; f32 accumulation and f32 tail).
    out_bf16 = jax.block_until_ready(
        reverse_func_batched(ts, ys, W, b, u, mul, mxu_dtype=jnp.bfloat16))
    assert jnp.allclose(out_bf16, ref, atol=5e-2, rtol=5e-2), "bf16 batched mismatch"

    # Single-evaluation path matching the original module's forward(t, y).
    out1 = jax.block_until_ready(reverse_func(ts[0], ys[0], W, b, u, mul))
    assert jnp.allclose(out1, ref[0], atol=1e-5, rtol=1e-5), "single-eval mismatch"

    print("KERNEL_OK")
</pallas_src>

<mosaic_0001>
module attributes {stable_mosaic.version = 11 : i64} {
  func.func @_reverse_func_kernel(%arg0: i32, %arg1: memref<1xf32, #tpu.memory_space<smem>>, %arg2: memref<64x128xf32, #tpu.memory_space<vmem>>, %arg3: memref<64x1xf32, #tpu.memory_space<vmem>>, %arg4: memref<128x128xf32, #tpu.memory_space<vmem>>, %arg5: memref<1x128xf32, #tpu.memory_space<vmem>>, %arg6: memref<1x128xf32, #tpu.memory_space<vmem>>, %arg7: memref<64x128xf32, #tpu.memory_space<vmem>>) attributes {dimension_semantics = [#tpu.dimension_semantics<parallel>], iteration_bounds = array<i64: 2>, scalar_prefetch = 0 : i64, scratch_operands = 0 : i64, tpu.core_type = #tpu.core_type<tc>, window_params = [{transform_indices = @transform_0, window_bounds = array<i64: 1>}, {transform_indices = @transform_1, window_bounds = array<i64: 64, 128>}, {transform_indices = @transform_2, window_bounds = array<i64: 64, 1>}, {pipeline_mode = #tpu.pipeline_mode<synchronous>, transform_indices = @transform_3, window_bounds = array<i64: 128, 128>}, {pipeline_mode = #tpu.pipeline_mode<synchronous>, transform_indices = @transform_4, window_bounds = array<i64: 1, 128>}, {pipeline_mode = #tpu.pipeline_mode<synchronous>, transform_indices = @transform_5, window_bounds = array<i64: 1, 128>}, {transform_indices = @transform_6, window_bounds = array<i64: 64, 128>}]} {
    %c0 = arith.constant 0 : index
    %0 = memref.load %arg1[%c0] : memref<1xf32, #tpu.memory_space<smem>>
    %c0_0 = arith.constant 0 : index
    %c0_1 = arith.constant 0 : index
    %1 = vector.load %arg3[%c0_0, %c0_1] : memref<64x1xf32, #tpu.memory_space<vmem>>, vector<64x1xf32>
    %c0_2 = arith.constant 0 : index
    %c0_3 = arith.constant 0 : index
    %2 = vector.load %arg6[%c0_2, %c0_3] : memref<1x128xf32, #tpu.memory_space<vmem>>, vector<1x128xf32>
    %3 = vector.broadcast %1 : vector<64x1xf32> to vector<64x128xf32>
    %4 = vector.broadcast %2 : vector<1x128xf32> to vector<64x128xf32>
    %5 = arith.mulf %3, %4 : vector<64x128xf32>
    %c0_4 = arith.constant 0 : index
    %c0_5 = arith.constant 0 : index
    %6 = vector.load %arg5[%c0_4, %c0_5] : memref<1x128xf32, #tpu.memory_space<vmem>>, vector<1x128xf32>
    %7 = vector.broadcast %6 : vector<1x128xf32> to vector<64x128xf32>
    %8 = arith.addf %5, %7 : vector<64x128xf32>
    %c0_6 = arith.constant 0 : index
    %c0_7 = arith.constant 0 : index
    %9 = vector.load %arg2[%c0_6, %c0_7] : memref<64x128xf32, #tpu.memory_space<vmem>>, vector<64x128xf32>
    %c0_8 = arith.constant 0 : index
    %c0_9 = arith.constant 0 : index
    %10 = vector.load %arg4[%c0_8, %c0_9] : memref<128x128xf32, #tpu.memory_space<vmem>>, vector<128x128xf32>
    %cst = arith.constant dense<0.000000e+00> : vector<64x128xf32>
    %11 = tpu.matmul %9, %10, %cst {dimension_numbers = #tpu.dot_dimension_numbers<[1], [0], [0], [1], [0, 0, 1, 1], [], []>} : vector<64x128xf32>, vector<128x128xf32>, vector<64x128xf32> -> vector<64x128xf32>
    %12 = arith.addf %11, %8 : vector<64x128xf32>
    %13 = math.tanh %12 : vector<64x128xf32>
    %14 = vector.broadcast %0 : f32 to vector<64x128xf32>
    %15 = arith.mulf %14, %13 : vector<64x128xf32>
    %c0_10 = arith.constant 0 : index
    %c0_11 = arith.constant 0 : index
    %16 = vector.load %arg7[%c0_10, %c0_11] : memref<64x128xf32, #tpu.memory_space<vmem>>, vector<64x128xf32>
    tpu.vector_store %arg7[%c0_10, %c0_11], %15 {strides = array<i32>} : memref<64x128xf32, #tpu.memory_space<vmem>>, vector<64x128xf32>,
    return
  }
  func.func @transform_0(%arg0: i32) -> i32 {
    %c0_i32 = arith.constant 0 : i32
    %c0_i32_0 = arith.constant 0 : i32
    return %c0_i32 : i32
  }
  func.func @transform_1(%arg0: i32) -> (i32, i32) {
    %c0_i32 = arith.constant 0 : i32
    %c0_i32_0 = arith.constant 0 : i32
    return %arg0, %c0_i32 : i32, i32
  }
  func.func @transform_2(%arg0: i32) -> (i32, i32) {
    %c0_i32 = arith.constant 0 : i32
    %c0_i32_0 = arith.constant 0 : i32
    return %arg0, %c0_i32 : i32, i32
  }
  func.func @transform_3(%arg0: i32) -> (i32, i32) {
    %c0_i32 = arith.constant 0 : i32
    %c0_i32_0 = arith.constant 0 : i32
    %c0_i32_1 = arith.constant 0 : i32
    return %c0_i32, %c0_i32_0 : i32, i32
  }
  func.func @transform_4(%arg0: i32) -> (i32, i32) {
    %c0_i32 = arith.constant 0 : i32
    %c0_i32_0 = arith.constant 0 : i32
    %c0_i32_1 = arith.constant 0 : i32
    return %c0_i32, %c0_i32_0 : i32, i32
  }
  func.func @transform_5(%arg0: i32) -> (i32, i32) {
    %c0_i32 = arith.constant 0 : i32
    %c0_i32_0 = arith.constant 0 : i32
    %c0_i32_1 = arith.constant 0 : i32
    return %c0_i32, %c0_i32_0 : i32, i32
  }
  func.func @transform_6(%arg0: i32) -> (i32, i32) {
    %c0_i32 = arith.constant 0 : i32
    %c0_i32_0 = arith.constant 0 : i32
    return %arg0, %c0_i32 : i32, i32
  }
}

</mosaic_0001>

<bundles_post_ra>
// kernel: tpu_custom_call.1
= control target key start
LH: loop header
LB: loop body
LE: loop exit
PB: predicated region body
PF: predicated region fallthrough
CT: control target
= control target key end

     0   :  { %s1143_s0 = inlined_call_operand.<no memory space> [shape: f32[1], index: 0, kind: input, shape index: {}]   ;;  %s1144_s1 = inlined_call_operand.vmem [shape: f32[128,128], index: 1, kind: input, shape index: {}]   ;;  %s1145_s2 = inlined_call_operand.vmem [shape: f32[128,1], index: 2, kind: input, shape index: {}]   ;;  %s1146_s3 = inlined_call_operand.hbm [shape: f32[128,128], index: 3, kind: input, shape index: {}]   ;;  %s1147_s4 = inlined_call_operand.vmem [shape: f32[1,128], index: 4, kind: input, shape index: {}]   ;;  %s1148_s5 = inlined_call_operand.vmem [shape: f32[1,128], index: 5, kind: input, shape index: {}]   ;;  %s1149_s6 = inlined_call_operand.hbm [shape: f32[128,128], index: 6, kind: output, shape index: {}]  }
   0x1   :  { %11 = sst [smem:[#allocation2]] %s1143_s0 }
   0x2   :  { %12 = vsyncpa [#allocation4], 0 }
   0x3   :  { %13 = vsyncpa [#allocation5], 0 }
   0x4   :  { %15 = vsyncpa [#allocation5 + $0x1], 0  ;;  %s973_s23 = smov 0   ;;  %s975_s24 = smov 0  }
   0x5   :  { %s977_s25 = smov 0   ;;  %s979_s26 = smov 0  }
   0x6 LB: > { %s994_s0 = sadd.s32 4294967295, %s926_s26   ;;  %s624_s27 = sadd.s32 4294967294, %s926_s26   ;;  %s926_s26 = sphi %s979_s26, %s1165_s26   ;;  %s922_s25 = sphi %s977_s25, %s1164_s25   ;;  %s918_s24 = sphi %s975_s24, %s1163_s24   ;;  %s914_s23 = sphi %s973_s23, %s1162_s23  }
   0x7   : > { %s998_s28 = sadd.s32 1, %s926_s26   ;;  %s164_s29 = sadd.s32 1, %s922_s25 }
   0x8   : > { %s161_s30 = ssub.s32 %s926_s26, %s998_s28  ;;  %p174_p0 = scmp.ne.s32.totalorder %s922_s25, %s918_s24 }
   0x9   : > { %p162_p1 = scmp.eq.s32.totalorder %s161_s30, 0  ;;  %p175_p2 = scmp.eq.s32.totalorder %s994_s0, 1 }
   0xa   : > { %p180_p3 = scmp.ne.s32.totalorder %s918_s24, %s914_s23  ;;  %p181_p4 = scmp.eq.s32.totalorder %s624_s27, 1 }
   0xb   : > { %s1009_s7 = scalar_select %p162_p1, %s922_s25, %s164_s29  }
   0xc   : > { %p1011_p5 = por %p175_p2, %p174_p0  ;;  %p1015_p6 = por %p181_p4, %p180_p3 }
   0xd   : > { %p625_p7 = scmp.ge.s32.totalorder %s926_s26, 1  ;;  %p188_p8 = scmp.lt.s32.totalorder %s926_s26, 3 }
   0xe   : > { %s1153_s8 = scalar_select %p1011_p5, 1, 0 }
   0xf   : > { %s1154_s9 = scalar_select %p1015_p6, 1, 0 }
  0x10   : > { %p1150_p9 = scmp.eq.s32.totalorder %s994_s0, 0  ;;  %p1022_p10 = pnand %p625_p7, %p188_p8 }
  0x11   : > { %s928_s11 = smov [#allocation3]   ;;  %s832_s16 = scalar_lea.hbm %s1146_s3, 2048 }
  0x12   : > { %s1155_s10 = scalar_select %p1022_p10, 1, 0 }
  0x13   : > { %s203_s12 = sshll.u32 %s928_s11, 4  ;;  %p765_p11 = pneg %p1022_p10  ;;  %s204_s12 = int_to_ptr.vmem [resolvable:$true] %s203_s12 }
  0x14   : > { %p833_p13 = scmp.ne.s32.totalorder %s1146_s3, %s832_s16  ;;  %p839_p3 = scmp.lt.u32.totalorder %s832_s16, %s1146_s3 }
  0x15   : > { %p1030_p12 = pnand %p1150_p9, %p765_p11 }
  0x17   : > { %p834_p0 = pneg %p1030_p12 }
  0x19   : > { %p835_p1 = pnand %p834_p0, %p833_p13 }
  0x1b   : > { %p836_p2 = pneg %p835_p1 }
  0x1d   : > { %p841_p4 = pnand %p839_p3, %p836_p2 }
  0x1f   : > { %844 = shalt.err (!%p841_p4)
}
  0x20   : > { %s845_s21 = scalar_lea.vmem %s204_s12, 2048  ;;  %p853_p9 = scmp.lt.s32.totalorder %s204_s12, %s204_s12 }
  0x21   : > { %p846_p7 = scmp.ne.s32.totalorder %s204_s12, %s845_s21  ;;  %p854_p6 = scmp.lt.s32.totalorder %s845_s21, %s845_s21 }
  0x23   : > { %p848_p8 = pnand %p846_p7, %p834_p0  ;;  %p855_p5 = por %p854_p6, %p853_p9 }
  0x25   : > { %p849_p11 = pneg %p848_p8 }
  0x27   : > { %p856_p10 = pnand %p855_p5, %p849_p11 }
  0x29   : > { %859 = shalt.err (!%p856_p10)
}
  0x2a   : > { %s929_s22 = smov 128   ;;  %s930_s27 = smov 8  }
  0x2b   : > { %768 = dma.hbm_to_vmem [thread:$0]  (!%p1030_p12), %s1146_s3, 2048, %s204_s12, [#allocation4], %s929_s22, %s929_s22, %s930_s27  }
  0x2c   : > { %p1157_p13 = scmp.ne.s32.totalorder %s1155_s10, 0 }
  0x2d   : > { %p1158_p1 = scmp.eq.s32.totalorder (!%p1157_p13), %s994_s0, 0 }
  0x2e   : > { %243 = sbr.rel (%p1157_p13) target bundleno = 338 (0x152), region = 44 }
  0x35   : > { %905 = dma.done.wait (%p1158_p1), [#allocation4], 2048   ;;  %p1159_p0 = pmov %p1158_p1 }
  0x36   : > { %s631_s11 = sshll.u32 %s994_s0, 3  ;;  %v931_v0 = vmov 0   ;;  %v378_v1 = vld [vmem:[#allocation3] sm:$0xff]  ;;  %v379_v2 = vld [vmem:[#allocation3 + $0x8] sm:$0xff]  ;;  %v380_v3 = vld [vmem:[#allocation3 + $0x10] sm:$0xff]  ;;  %s291_s22 = sld [smem:[#allocation2]] }
  0x37   : > { %907 = vsyncadd (%p1159_p0), [#allocation4], 4294965248  ;;  %p279_p5 = scmp.lt.s32.totalorder %s631_s11, 15  ;;  %815 = vset.pattern.permute.xlu1 %v931_v0  ;;  %814 = vset.pattern.permute.xlu0 %v931_v0  ;;  %v711_v4 = vpack.c.bf16 %v379_v2, %v378_v1  ;;  %v381_v5 = vld [vmem:[#allocation3 + $0x18] sm:$0xff]  ;;  %v382_v7 = vld [vmem:[#allocation3 + $0x20] sm:$0xff]  ;;  %s275_s27 = sand.u32 1, %s918_s24  }
  0x38   : > { %v715_v6 = vpack.c.bf16 %v381_v5, %v380_v3  ;;  %v383_v8 = vld [vmem:[#allocation3 + $0x28] sm:$0xff]  ;;  %v384_v12 = vld [vmem:[#allocation3 + $0x30] sm:$0xff]  ;;  %v385_v13 = vld [vmem:[#allocation3 + $0x38] sm:$0xff]  ;;  %s630_s29 = sshll.u32 %s275_s27, 6  ;;  %p1160_p9 = scmp.ne.s32.totalorder %s1153_s8, 0 }
  0x39   : > { %s1167_s11 = smov (!%p279_p5, %s631_s11), 15  ;;  %712 = vmatprep.subr.bf16.mxu0 %v711_v4  ;;  %743 = vmatprep.subr.bf16.mxu1 %v711_v4  ;;  %v719_v9 = vpack.c.bf16 %v383_v8, %v382_v7  ;;  %v723_v16 = vpack.c.bf16 %v385_v13, %v384_v12  ;;  %v386_v17 = vld [vmem:[#allocation3 + $0x40] sm:$0xff]  ;;  %v387_v18 = vld [vmem:[#allocation3 + $0x48] sm:$0xff]  ;;  %v388_v22 = vld [vmem:[#allocation3 + $0x50] sm:$0xff]  ;;  %s277_s30 = scalar_lea.vmem [#allocation6], %s630_s29 }
  0x3a   : > { %s632_s13 = sshll.u32 %s1167_s11, 3  ;;  %714 = vmatpush3.bf16.msra.mxu0 %v711_v4  ;;  %751 = vmatpush3.bf16.msra.mxu1 %v711_v4  ;;  %v727_v21 = vpack.c.bf16 %v387_v18, %v386_v17  ;;  %v389_v23 = vld [vmem:[#allocation3 + $0x58] sm:$0xff]  ;;  %v390_v27 = vld [vmem:[#allocation3 + $0x60] sm:$0xff]  ;;  %v391_v28 = vld [vmem:[#allocation3 + $0x68] sm:$0xff]  ;;  %s642_s11 = sshll.u32 %s994_s0, 10 }
  0x3b   : > { %s1060_s14 = scalar_lea.vmem %s1144_s1, %s632_s13  ;;  %716 = vmatprep.subr.bf16.mxu0 %v715_v6  ;;  %744 = vmatprep.subr.bf16.mxu1 %v715_v6  ;;  %s1067_s17 = scalar_lea.vmem %s1145_s2, %s632_s13  ;;  %v731_v26 = vpack.c.bf16 %v389_v23, %v388_v22  ;;  %v735_v31 = vpack.c.bf16 %v391_v28, %v390_v27  ;;  %v392_v32 = vld [vmem:[#allocation3 + $0x70] sm:$0xff]  ;;  %v393_v33 = vld [vmem:[#allocation3 + $0x78] sm:$0xff]  ;;  %v635_v47 = vld [vmem:[%s1148_s5] ss:$0 sm:$0xff] }
  0x3c   : > { %v370_v10 = vld [vmem:[%s1060_s14] sm:$0xff]  ;;  %v294_v14 = vld [vmem:[%s1067_s17 + $0x10] sm:$0xff]  ;;  %v295_v19 = vld [vmem:[%s1067_s17 + $0x18] sm:$0xff]  ;;  %v739_v34 = vpack.c.bf16 %v393_v33, %v392_v32  ;;  %s538_s13 = sshll.u32 %s277_s30, 4  ;;  %s1102_s0 = scalar_lea.sflag [#allocation5], %s275_s27  ;;  %s1098_s13 = int_to_ptr.vmem [resolvable:$true] %s538_s13 }
  0x3d   : > { %v374_v11 = vld [vmem:[%s1060_s14 + $0x20] sm:$0xff]  ;;  %699 = vmatprep.mubr.f32.mxu0 %v370_v10  ;;  %313 = vperm.xlu1 %815, %v294_v14   ;;  %v293_v20 = vld [vmem:[%s1067_s17 + $0x8] sm:$0xff]  ;;  %v299_v29 = vld [vmem:[%s1067_s17 + $0x38] sm:$0xff]  ;;  %s860_s15 = scalar_lea.vmem %s1098_s13, 1024  ;;  %s932_s16 = smov [#allocation6]  }
  0x3e   : > { %705 = vmatprep.mubr.f32.mxu1 %v374_v11  ;;  %718 = vmatpush3.bf16.msra.mxu0 %v715_v6  ;;  %v292_v15 = vld [vmem:[%s1067_s17] sm:$0xff]  ;;  %v297_v24 = vld [vmem:[%s1067_s17 + $0x28] sm:$0xff]  ;;  %v298_v30 = vld [vmem:[%s1067_s17 + $0x30] sm:$0xff]  ;;  %p861_p6 = scmp.ne.s32.totalorder %s1098_s13, %s860_s15 }
  0x3f   : > { %752 = vmatpush3.bf16.msra.mxu1 %v715_v6  ;;  %720 = vmatprep.subr.bf16.mxu0 %v719_v9  ;;  %v296_v25 = vld [vmem:[%s1067_s17 + $0x20] sm:$0xff]  ;;  %v371_v35 = vld [vmem:[%s1060_s14 + $0x8] sm:$0xff]  ;;  %v372_v37 = vld [vmem:[%s1060_s14 + $0x10] sm:$0xff]  ;;  %s864_s17 = sshll.u32 %s932_s16, 4  ;;  %s865_s17 = int_to_ptr.vmem [resolvable:$false] %s864_s17 }
  0x40   : > { %745 = vmatprep.subr.bf16.mxu1 %v719_v9  ;;  %303 = vperm.xlu0 %814, %v292_v15   ;;  %v375_v36 = vld [vmem:[%s1060_s14 + $0x28] sm:$0xff]  ;;  %v376_v38 = vld [vmem:[%s1060_s14 + $0x30] sm:$0xff]  ;;  %v373_v39 = vld [vmem:[%s1060_s14 + $0x18] sm:$0xff]  ;;  %p862_p10 = pnand %p861_p6, %p1160_p9  ;;  %s866_s18 = scalar_lea.vmem %s865_s17, 2048 }
  0x41   : > { %318 = vperm.xlu1 %815, %v295_v19   ;;  %v377_v40 = vld [vmem:[%s1060_s14 + $0x38] sm:$0xff]  ;;  %v636_v53 = vld [vmem:[%s1147_s4] ss:$0 sm:$0xff]  ;;  %v507_v19 = vstv %s291_s22  ;;  %s1096_s14 = scalar_lea.hbm %s1149_s6, %s642_s11  ;;  %p867_p2 = scmp.lt.s32.totalorder %s1098_s13, %s865_s17 }
  0x42   : > { %722 = vmatpush3.bf16.msra.mxu0 %v719_v9  ;;  %p863_p12 = pneg %p862_p10  ;;  %p868_p3 = scmp.lt.s32.totalorder %s866_s18, %s860_s15 }
  0x43   : > { %753 = vmatpush3.bf16.msra.mxu1 %v719_v9  ;;  %724 = vmatprep.subr.bf16.mxu0 %v723_v16 }
  0x44   : > { %746 = vmatprep.subr.bf16.mxu1 %v723_v16  ;;  %308 = vperm.xlu0 %814, %v293_v20   ;;  %p869_p4 = por %p868_p3, %p867_p2 }
  0x45   : > { %328 = vperm.xlu1 %815, %v297_v24  }
  0x46   : > { %726 = vmatpush3.bf16.msra.mxu0 %v723_v16  ;;  %p870_p7 = pnand %p869_p4, %p863_p12 }
  0x47   : > { %754 = vmatpush3.bf16.msra.mxu1 %v723_v16  ;;  %728 = vmatprep.subr.bf16.mxu0 %v727_v21 }
  0x48   : > { %747 = vmatprep.subr.bf16.mxu1 %v727_v21  ;;  %323 = vperm.xlu0 %814, %v296_v25  }
  0x49   : > { %338 = vperm.xlu1 %815, %v299_v29  }
  0x4a   : > { %730 = vmatpush3.bf16.msra.mxu0 %v727_v21 }
  0x4b   : > { %755 = vmatpush3.bf16.msra.mxu1 %v727_v21  ;;  %732 = vmatprep.subr.bf16.mxu0 %v731_v26 }
  0x4c   : > { %748 = vmatprep.subr.bf16.mxu1 %v731_v26  ;;  %333 = vperm.xlu0 %814, %v298_v30  }
  0x4e   : > { %734 = vmatpush3.bf16.msra.mxu0 %v731_v26 }
  0x4f   : > { %756 = vmatpush3.bf16.msra.mxu1 %v731_v26  ;;  %736 = vmatprep.subr.bf16.mxu0 %v735_v31 }
  0x50   : > { %749 = vmatprep.subr.bf16.mxu1 %v735_v31 }
  0x52   : > { %738 = vmatpush3.bf16.msra.mxu0 %v735_v31 }
  0x53   : > { %757 = vmatpush3.bf16.msra.mxu1 %v735_v31  ;;  %740 = vmatprep.subr.bf16.mxu0 %v739_v34 }
  0x54   : > { %750 = vmatprep.subr.bf16.mxu1 %v739_v34 }
  0x56   : > { %742 = vmatpush3.bf16.msra.mxu0 %v739_v34 }
  0x57   : > { %758 = vmatpush3.bf16.msra.mxu1 %v739_v34 }
  0x59   : > { %700 = vmatmul.mubr.f32.vlgmr.msra.gmra.mrb[0].mxu0 %v371_v35 }
  0x5a   : > { %706 = vmatmul.mubr.f32.vlgmr.msra.gmra.mrb[0].mxu1 %v375_v36  ;;  %702 = vmatprep.mubr.f32.mxu0 %v372_v37 }
  0x5b   : > { %708 = vmatprep.mubr.f32.mxu1 %v376_v38 }
  0x5d   : > { %703 = vmatmul.mubr.f32.gmra.mrb[2].mxu0 %v373_v39 }
  0x5e   : > { %709 = vmatmul.mubr.f32.gmra.mrb[2].mxu1 %v377_v40 }
  0xbc   : > { %v314_v41 = vpop.permute.xlu1 %313 }
  0xbd   : > { %v349_v59 = vmul.f32 %v635_v47, %v314_v41 }
  0xbf   : > { %v304_v42 = vpop.permute.xlu0 %303  ;;  %v364_v11 = vadd.f32 %v636_v53, %v349_v59 }
  0xc0   : > { %v319_v43 = vpop.permute.xlu1 %318  ;;  %v347_v50 = vmul.f32 %v635_v47, %v304_v42 }
  0xc1   : > { %v350_v55 = vmul.f32 %v635_v47, %v319_v43 }
  0xc2   : > { %v362_v63 = vadd.f32 %v636_v53, %v347_v50 }
  0xc3   : > { %v309_v44 = vpop.permute.xlu0 %308  ;;  %v365_v7 = vadd.f32 %v636_v53, %v350_v55 }
  0xc4   : > { %v329_v45 = vpop.permute.xlu1 %328  ;;  %v348_v48 = vmul.f32 %v635_v47, %v309_v44 }
  0xc5   : > { %v352_v49 = vmul.f32 %v635_v47, %v329_v45 }
  0xc6   : > { %v363_v57 = vadd.f32 %v636_v53, %v348_v48 }
  0xc7   : > { %v324_v46 = vpop.permute.xlu0 %323  ;;  %v367_v58 = vadd.f32 %v636_v53, %v352_v49 }
  0xc8   : > { %v351_v51 = vmul.f32 %v635_v47, %v324_v46  ;;  %v339_v52 = vpop.permute.xlu1 %338 }
  0xc9   : > { %v354_v56 = vmul.f32 %v635_v47, %v339_v52 }
  0xca   : > { %v366_v0 = vadd.f32 %v636_v53, %v351_v51 }
  0xcb   : > { %v334_v54 = vpop.permute.xlu0 %333  ;;  %v369_v8 = vadd.f32 %v636_v53, %v354_v56 }
  0xcc   : > { %v353_v60 = vmul.f32 %v635_v47, %v334_v54 }
  0xce   : > { %v368_v12 = vadd.f32 %v636_v53, %v353_v60 }
 0x12c   : > { %v701_v61 = vpop.f32.mrb[0].mxu0 }
 0x12d   : > { %v707_v62 = vpop.f32.mrb[0].mxu1  ;;  %v466_v1 = vadd.f32 %v701_v61, %v363_v57  ;;  %v460_v3 = vpop.f32.mrb[1].mxu0 }
 0x12e   : > { %v486_v2 = vadd.f32 %v707_v62, %v367_v58  ;;  %v480_v4 = vpop.f32.mrb[1].mxu1  ;;  %v461_v5 = vadd.f32 %v460_v3, %v362_v63 }
 0x12f   : > { %v481_v6 = vadd.f32 %v480_v4, %v366_v0  ;;  %816 = vtanh.f32 %v466_v1 }
 0x130   : > { %818 = vtanh.f32 %v486_v2  ;;  %v704_v9 = vpop.f32.mrb[2].mxu0 }
 0x131   : > { %v710_v10 = vpop.f32.mrb[2].mxu1  ;;  %820 = vtanh.f32 %v461_v5  ;;  %v476_v13 = vadd.f32 %v704_v9, %v365_v7  ;;  %v470_v15 = vpop.f32.mrb[3].mxu0 }
 0x132   : > { %v496_v14 = vadd.f32 %v710_v10, %v369_v8  ;;  %v490_v16 = vpop.f32.mrb[3].mxu1  ;;  %822 = vtanh.f32 %v481_v6  ;;  %v471_v17 = vadd.f32 %v470_v15, %v364_v11 }
 0x133   : > { %v491_v18 = vadd.f32 %v490_v16, %v368_v12  ;;  %824 = vtanh.f32 %v476_v13 }
 0x134   : > { %826 = vtanh.f32 %v496_v14 }
 0x135   : > { %828 = vtanh.f32 %v471_v17 }
 0x136   : > { %830 = vtanh.f32 %v491_v18 }
 0x139   : > { %v817_v20 = vpop.eup %816 }
 0x13a   : > { %v819_v21 = vpop.eup %818  ;;  %v509_v22 = vmul.f32 %v817_v20, %v507_v19 }
 0x13b   : > { %v821_v23 = vpop.eup %820  ;;  %v513_v24 = vmul.f32 %v819_v21, %v507_v19 }
 0x13c   : > { %v823_v25 = vpop.eup %822  ;;  %517 = vst [vmem:[%s277_s30 + $0x8] sm:$0xff] %v509_v22  ;;  %v508_v26 = vmul.f32 %v821_v23, %v507_v19 }
 0x13d   : > { %v825_v27 = vpop.eup %824  ;;  %521 = vst [vmem:[%s277_s30 + $0x28] sm:$0xff] %v513_v24  ;;  %v512_v28 = vmul.f32 %v823_v25, %v507_v19 }
 0x13e   : > { %v827_v29 = vpop.eup %826  ;;  %516 = vst [vmem:[%s277_s30] sm:$0xff] %v508_v26  ;;  %v511_v30 = vmul.f32 %v825_v27, %v507_v19 }
 0x13f   : > { %v829_v31 = vpop.eup %828  ;;  %520 = vst [vmem:[%s277_s30 + $0x20] sm:$0xff] %v512_v28  ;;  %v515_v32 = vmul.f32 %v827_v29, %v507_v19 }
 0x140   : > { %v831_v33 = vpop.eup %830  ;;  %519 = vst [vmem:[%s277_s30 + $0x18] sm:$0xff] %v511_v30  ;;  %v510_v34 = vmul.f32 %v829_v31, %v507_v19 }
 0x141   : > { %523 = vst [vmem:[%s277_s30 + $0x38] sm:$0xff] %v515_v32  ;;  %v514_v35 = vmul.f32 %v831_v33, %v507_v19 }
 0x142   : > { %518 = vst [vmem:[%s277_s30 + $0x10] sm:$0xff] %v510_v34 }
 0x143   : > { %522 = vst [vmem:[%s277_s30 + $0x30] sm:$0xff] %v514_v35 }
 0x144   : > { %873 = shalt.err (!%p870_p7)
}
 0x145   : > { %s874_s19 = scalar_lea.hbm %s1096_s14, 1024  ;;  %s878_s22 = scalar_lea.hbm %s1149_s6, 2048 }
 0x146   : > { %p875_p8 = scmp.ne.s32.totalorder %s1096_s14, %s874_s19  ;;  %p879_p1 = scmp.lt.u32.totalorder %s1096_s14, %s1149_s6 }
 0x147   : > { %p880_p0 = scmp.lt.u32.totalorder %s878_s22, %s874_s19  ;;  %p882_p6 = scmp.lt.u32.totalorder %s874_s19, %s1096_s14 }
 0x148   : > { %p876_p11 = pnand %p875_p8, %p1160_p9 }
 0x149   : > { %p881_p5 = por %p880_p0, %p879_p1 }
 0x14a   : > { %p877_p13 = pneg %p876_p11 }
 0x14b   : > { %p883_p10 = por %p882_p6, %p881_p5 }
 0x14d   : > { %p884_p12 = pnand %p883_p10, %p877_p13 }
 0x14f   : > { %887 = shalt.err (!%p884_p12)
}
 0x150   : > { %s933_s30 = smov 128   ;;  %s934_s11 = smov 8  }
 0x151   : > { %763 = dma.vmem_to_hbm [thread:$0]  (%p1160_p9), %s1098_s13, 1024, %s1096_s14, %s1102_s0, %s933_s30, %s933_s30, %s934_s11  }
 0x152 PF: > { %p775_p2 = scmp.ge.s32.totalorder %s926_s26, 2  ;;  %s553_s10 = sand.u32 1, %s914_s23  }
 0x153   : > { %p1161_p3 = scmp.ne.s32.totalorder %s1154_s9, 0  ;;  %s554_s12 = scalar_lea.sflag [#allocation5], %s553_s10 }
 0x155   : > { %p770_p4 = pnand %p775_p2, %p1161_p3 }
 0x157   : > { %909 = dma.done.wait (!%p770_p4), %s554_s12, 1024  }
 0x158   : > { %911 = vsyncadd (!%p770_p4), %s554_s12, 4294966272  ;;  %p18_p7 = scmp.ge.s32.totalorder %s998_s28, 4   ;;  %s1162_s23 = smov %s918_s24 }
 0x159   : > { %s1163_s24 = smov %s922_s25  ;;  %s1164_s25 = smov %s1009_s7 }
 0x15a   : > { %s1165_s26 = smov %s998_s28  ;;  %20 = sbr.rel (!%p18_p7) target bundleno = 6 (0x6), region = 87 }
 0x161   :  { %559 = vsyncpa [#allocation4], 1 }
 0x162   :  { %561 = vsyncpa [#allocation4 + $0x1], 1 }
 0x163   :  { %562 = vsyncpa [#allocation5], 1 }
 0x164   :  { %564 = vsyncpa [#allocation5 + $0x1], 1 }

</bundles_post_ra>
